<compile_context>
chip_gen: v6e
topology: v6e:2x2x1
jax: 0.10.0
libtpu: 0.0.40
codegen_flags: <defaults>
</compile_context>

<pallas_src>
import math
from functools import partial

import jax
import jax.numpy as jnp
from jax.experimental import pallas as pl
from jax.experimental.pallas import tpu as pltpu

HIDDEN = 128


def actor_kernel(x_ref, w1_ref, b1_ref, w2_ref, b2_ref, wh_ref, bh_ref,
                 out_ref, *, half):
    # fc1 + relu  (bf16 operands, f32 accumulation on the MXU, f32 epilogue)
    h1 = jnp.dot(x_ref[...], w1_ref[...], preferred_element_type=jnp.float32)
    h1 = jnp.maximum(h1 + b1_ref[...], 0.0)

    # fc2 + relu
    h2 = jnp.dot(h1.astype(w2_ref.dtype), w2_ref[...],
                 preferred_element_type=jnp.float32)
    h2 = jnp.maximum(h2 + b2_ref[...], 0.0)

    # Fused (mu | sigma) head: one lane-dense [HIDDEN, 2*half] matmul.
    heads = jnp.dot(h2.astype(wh_ref.dtype), wh_ref[...],
                    preferred_element_type=jnp.float32)
    heads = heads + bh_ref[...]

    col = jax.lax.broadcasted_iota(jnp.int32, heads.shape, dimension=1)
    mu = 2.0 * jnp.tanh(heads)                 # EUP
    sigma = jnp.logaddexp(heads, 0.0)          # numerically stable softplus
    out_ref[...] = jnp.where(col < half, mu, sigma).astype(out_ref.dtype)


def actor_continuous_forward(x, params, *, block_b=256,
                             compute_dtype=jnp.bfloat16):
    """x: [B, state_size] float32. Returns (mu, sigma), each [B, action_size] f32."""
    w1, b1, w2, b2, wmu, bmu, wsig, bsig = params
    B, S = x.shape
    H = w1.shape[1]
    A = wmu.shape[1]

    # Pack the two A-wide heads into one lane-dense slab: mu in cols [0, half),
    # sigma in cols [half, 2*half); half is a multiple of 64 so the output width
    # (2*half) is a multiple of 128 -> unmasked vector stores.
    half = 64 * max(1, -(-A // 64))
    wh = jnp.zeros((H, 2 * half), jnp.float32)
    wh = wh.at[:, :A].set(wmu).at[:, half:half + A].set(wsig)
    bh = jnp.zeros((1, 2 * half), jnp.float32)
    bh = bh.at[:, :A].set(bmu).at[:, half:half + A].set(bsig)

    # bf16 operands for the MXU; biases stay f32 (added post-accumulation).
    xc = x.astype(compute_dtype)
    w1c = w1.astype(compute_dtype)
    w2c = w2.astype(compute_dtype)
    whc = wh.astype(compute_dtype)

    # Batch tile: multiple of 16 (bf16 sublane packing). Pad B up to a whole
    # number of tiles (rows are independent; padded rows are sliced off below).
    tb = min(block_b, max(16, 16 * (-(-B // 16))))
    Bp = tb * (-(-B // tb))
    if Bp != B:
        xc = jnp.pad(xc, ((0, Bp - B), (0, 0)))

    pinned = lambda shape: pl.BlockSpec(shape, lambda i: (0, 0))

    out = pl.pallas_call(
        partial(actor_kernel, half=half),
        out_shape=jax.ShapeDtypeStruct((Bp, 2 * half), jnp.float32),
        grid=(Bp // tb,),
        in_specs=[
            pl.BlockSpec((tb, S), lambda i: (i, 0)),   # x tile, pipelined
            pinned((S, H)), pinned((1, H)),            # fc1
            pinned((H, H)), pinned((1, H)),            # fc2
            pinned((H, 2 * half)), pinned((1, 2 * half)),  # fused heads
        ],
        out_specs=pl.BlockSpec((tb, 2 * half), lambda i: (i, 0)),
        compiler_params=pltpu.CompilerParams(
            dimension_semantics=("parallel",),         # megacore on v7x
            vmem_limit_bytes=16 << 20,
        ),
    )(xc, w1c, b1, w2c, b2, whc, bh)

    mu = out[:B, :A]
    sigma = out[:B, half:half + A]
    return mu, sigma


def init_params(key, state_size, action_size, hidden=HIDDEN):
    """Deterministic synthetic params (PyTorch Linear init, transposed to [in, out])."""
    ks = jax.random.split(key, 8)

    def lin(kw, kb, fan_in, fan_out):
        bound = 1.0 / math.sqrt(fan_in)
        w = jax.random.uniform(kw, (fan_in, fan_out), jnp.float32, -bound, bound)
        b = jax.random.uniform(kb, (1, fan_out), jnp.float32, -bound, bound)
        return w, b

    w1, b1 = lin(ks[0], ks[1], state_size, hidden)
    w2, b2 = lin(ks[2], ks[3], hidden, hidden)
    wmu, bmu = lin(ks[4], ks[5], hidden, action_size)
    wsig, bsig = lin(ks[6], ks[7], hidden, action_size)
    return (w1, b1, w2, b2, wmu, bmu, wsig, bsig)


def reference_forward(x, params, compute_dtype=jnp.bfloat16):
    """Pure-JAX reference with the same bf16 operands / f32 accumulation."""
    w1, b1, w2, b2, wmu, bmu, wsig, bsig = params
    cd = compute_dtype
    h1 = jnp.maximum(jnp.dot(x.astype(cd), w1.astype(cd),
                             preferred_element_type=jnp.float32) + b1, 0.0)
    h2 = jnp.maximum(jnp.dot(h1.astype(cd), w2.astype(cd),
                             preferred_element_type=jnp.float32) + b2, 0.0)
    mu = 2.0 * jnp.tanh(jnp.dot(h2.astype(cd), wmu.astype(cd),
                                preferred_element_type=jnp.float32) + bmu)
    sigma = jax.nn.softplus(jnp.dot(h2.astype(cd), wsig.astype(cd),
                                    preferred_element_type=jnp.float32) + bsig)
    return mu, sigma


if __name__ == "__main__":
    state_size = 8
    action_size = 4
    batch = 100   # not a tile multiple -> exercises padding + multi-step grid

    key = jax.random.PRNGKey(0)
    kx, kp = jax.random.split(key)
    x = jax.random.normal(kx, (batch, state_size), jnp.float32)
    params = init_params(kp, state_size, action_size)

    # Small block_b for the demo so the grid actually has several steps; at
    # production rollout batch sizes use the default block_b=256 (or larger).
    mu, sigma = actor_continuous_forward(x, params, block_b=32)
    jax.block_until_ready((mu, sigma))

    mu_ref, sigma_ref = reference_forward(x, params)
    assert mu.shape == (batch, action_size)
    assert sigma.shape == (batch, action_size)
    assert jnp.allclose(mu, mu_ref, atol=1e-3, rtol=1e-3)
    assert jnp.allclose(sigma, sigma_ref, atol=1e-3, rtol=1e-3)
    assert bool(jnp.all(sigma > 0.0))

    # TODO(synk): the `act()` method's Normal sampling / log_prob is host-side
    # distribution logic, not a kernel hot path; it is left out of the kernel.

    print("KERNEL_OK")
</pallas_src>

<mosaic_0001>
module attributes {stable_mosaic.version = 11 : i64} {
  func.func @actor_kernel(%arg0: i32, %arg1: memref<32x8xbf16, #tpu.memory_space<vmem>>, %arg2: memref<8x128xbf16, #tpu.memory_space<vmem>>, %arg3: memref<1x128xf32, #tpu.memory_space<vmem>>, %arg4: memref<128x128xbf16, #tpu.memory_space<vmem>>, %arg5: memref<1x128xf32, #tpu.memory_space<vmem>>, %arg6: memref<128x128xbf16, #tpu.memory_space<vmem>>, %arg7: memref<1x128xf32, #tpu.memory_space<vmem>>, %arg8: memref<32x128xf32, #tpu.memory_space<vmem>>) attributes {dimension_semantics = [#tpu.dimension_semantics<parallel>], iteration_bounds = array<i64: 4>, scalar_prefetch = 0 : i64, scratch_operands = 0 : i64, tpu.core_type = #tpu.core_type<tc>, window_params = [{transform_indices = @transform_0, window_bounds = array<i64: 32, 8>}, {pipeline_mode = #tpu.pipeline_mode<synchronous>, transform_indices = @transform_1, window_bounds = array<i64: 8, 128>}, {pipeline_mode = #tpu.pipeline_mode<synchronous>, transform_indices = @transform_2, window_bounds = array<i64: 1, 128>}, {pipeline_mode = #tpu.pipeline_mode<synchronous>, transform_indices = @transform_3, window_bounds = array<i64: 128, 128>}, {pipeline_mode = #tpu.pipeline_mode<synchronous>, transform_indices = @transform_4, window_bounds = array<i64: 1, 128>}, {pipeline_mode = #tpu.pipeline_mode<synchronous>, transform_indices = @transform_5, window_bounds = array<i64: 128, 128>}, {pipeline_mode = #tpu.pipeline_mode<synchronous>, transform_indices = @transform_6, window_bounds = array<i64: 1, 128>}, {transform_indices = @transform_7, window_bounds = array<i64: 32, 128>}]} {
    %c0 = arith.constant 0 : index
    %c0_0 = arith.constant 0 : index
    %0 = vector.load %arg1[%c0, %c0_0] : memref<32x8xbf16, #tpu.memory_space<vmem>>, vector<32x8xbf16>
    %c0_1 = arith.constant 0 : index
    %c0_2 = arith.constant 0 : index
    %1 = vector.load %arg2[%c0_1, %c0_2] : memref<8x128xbf16, #tpu.memory_space<vmem>>, vector<8x128xbf16>
    %cst = arith.constant dense<0.000000e+00> : vector<32x128xf32>
    %2 = tpu.matmul %0, %1, %cst {dimension_numbers = #tpu.dot_dimension_numbers<[1], [0], [0], [1], [0, 0, 1, 1], [], []>} : vector<32x8xbf16>, vector<8x128xbf16>, vector<32x128xf32> -> vector<32x128xf32>
    %c0_3 = arith.constant 0 : index
    %c0_4 = arith.constant 0 : index
    %3 = vector.load %arg3[%c0_3, %c0_4] : memref<1x128xf32, #tpu.memory_space<vmem>>, vector<1x128xf32>
    %4 = vector.broadcast %3 : vector<1x128xf32> to vector<32x128xf32>
    %5 = arith.addf %2, %4 : vector<32x128xf32>
    %cst_5 = arith.constant 0.000000e+00 : f32
    %6 = vector.broadcast %cst_5 : f32 to vector<32x128xf32>
    %7 = arith.maximumf %5, %6 : vector<32x128xf32>
    %8 = arith.truncf %7 : vector<32x128xf32> to vector<32x128xbf16>
    %c0_6 = arith.constant 0 : index
    %c0_7 = arith.constant 0 : index
    %9 = vector.load %arg4[%c0_6, %c0_7] : memref<128x128xbf16, #tpu.memory_space<vmem>>, vector<128x128xbf16>
    %cst_8 = arith.constant dense<0.000000e+00> : vector<32x128xf32>
    %10 = tpu.matmul %8, %9, %cst_8 {dimension_numbers = #tpu.dot_dimension_numbers<[1], [0], [0], [1], [0, 0, 1, 1], [], []>} : vector<32x128xbf16>, vector<128x128xbf16>, vector<32x128xf32> -> vector<32x128xf32>
    %c0_9 = arith.constant 0 : index
    %c0_10 = arith.constant 0 : index
    %11 = vector.load %arg5[%c0_9, %c0_10] : memref<1x128xf32, #tpu.memory_space<vmem>>, vector<1x128xf32>
    %12 = vector.broadcast %11 : vector<1x128xf32> to vector<32x128xf32>
    %13 = arith.addf %10, %12 : vector<32x128xf32>
    %cst_11 = arith.constant 0.000000e+00 : f32
    %14 = vector.broadcast %cst_11 : f32 to vector<32x128xf32>
    %15 = arith.maximumf %13, %14 : vector<32x128xf32>
    %16 = arith.truncf %15 : vector<32x128xf32> to vector<32x128xbf16>
    %c0_12 = arith.constant 0 : index
    %c0_13 = arith.constant 0 : index
    %17 = vector.load %arg6[%c0_12, %c0_13] : memref<128x128xbf16, #tpu.memory_space<vmem>>, vector<128x128xbf16>
    %cst_14 = arith.constant dense<0.000000e+00> : vector<32x128xf32>
    %18 = tpu.matmul %16, %17, %cst_14 {dimension_numbers = #tpu.dot_dimension_numbers<[1], [0], [0], [1], [0, 0, 1, 1], [], []>} : vector<32x128xbf16>, vector<128x128xbf16>, vector<32x128xf32> -> vector<32x128xf32>
    %c0_15 = arith.constant 0 : index
    %c0_16 = arith.constant 0 : index
    %19 = vector.load %arg7[%c0_15, %c0_16] : memref<1x128xf32, #tpu.memory_space<vmem>>, vector<1x128xf32>
    %20 = vector.broadcast %19 : vector<1x128xf32> to vector<32x128xf32>
    %21 = arith.addf %18, %20 : vector<32x128xf32>
    %22 = tpu.iota {dimensions = array<i32: 1>} : vector<32x128xi32>
    %23 = math.tanh %21 : vector<32x128xf32>
    %cst_17 = arith.constant 2.000000e+00 : f32
    %24 = vector.broadcast %cst_17 : f32 to vector<32x128xf32>
    %25 = arith.mulf %24, %23 : vector<32x128xf32>
    %cst_18 = arith.constant 0.000000e+00 : f32
    %26 = vector.broadcast %cst_18 : f32 to vector<32x128xf32>
    %27 = arith.maximumf %21, %26 : vector<32x128xf32>
    %28 = vector.broadcast %cst_18 : f32 to vector<32x128xf32>
    %29 = arith.subf %21, %28 : vector<32x128xf32>
    %30 = arith.cmpf one, %29, %29 : vector<32x128xf32>
    %31 = vector.broadcast %cst_18 : f32 to vector<32x128xf32>
    %32 = arith.addf %21, %31 : vector<32x128xf32>
    %33 = math.absf %29 : vector<32x128xf32>
    %cst_19 = arith.constant 0.000000e+00 : f32
    %34 = vector.broadcast %cst_19 : f32 to vector<32x128xf32>
    %35 = arith.subf %34, %33 : vector<32x128xf32>
    %36 = math.exp %35 : vector<32x128xf32>
    %37 = math.log1p %36 : vector<32x128xf32>
    %38 = arith.addf %27, %37 : vector<32x128xf32>
    %39 = arith.select %30, %32, %38 : vector<32x128xi1>, vector<32x128xf32>
    %c64_i32 = arith.constant 64 : i32
    %40 = vector.broadcast %c64_i32 : i32 to vector<32x128xi32>
    %41 = arith.cmpi slt, %22, %40 : vector<32x128xi32>
    %42 = arith.select %41, %25, %39 : vector<32x128xi1>, vector<32x128xf32>
    %c0_20 = arith.constant 0 : index
    %c0_21 = arith.constant 0 : index
    %43 = vector.load %arg8[%c0_20, %c0_21] : memref<32x128xf32, #tpu.memory_space<vmem>>, vector<32x128xf32>
    tpu.vector_store %arg8[%c0_20, %c0_21], %42 {strides = array<i32>} : memref<32x128xf32, #tpu.memory_space<vmem>>, vector<32x128xf32>,
    return
  }
  func.func @transform_0(%arg0: i32) -> (i32, i32) {
    %c0_i32 = arith.constant 0 : i32
    %c0_i32_0 = arith.constant 0 : i32
    return %arg0, %c0_i32 : i32, i32
  }
  func.func @transform_1(%arg0: i32) -> (i32, i32) {
    %c0_i32 = arith.constant 0 : i32
    %c0_i32_0 = arith.constant 0 : i32
    %c0_i32_1 = arith.constant 0 : i32
    return %c0_i32, %c0_i32_0 : i32, i32
  }
  func.func @transform_2(%arg0: i32) -> (i32, i32) {
    %c0_i32 = arith.constant 0 : i32
    %c0_i32_0 = arith.constant 0 : i32
    %c0_i32_1 = arith.constant 0 : i32
    return %c0_i32, %c0_i32_0 : i32, i32
  }
  func.func @transform_3(%arg0: i32) -> (i32, i32) {
    %c0_i32 = arith.constant 0 : i32
    %c0_i32_0 = arith.constant 0 : i32
    %c0_i32_1 = arith.constant 0 : i32
    return %c0_i32, %c0_i32_0 : i32, i32
  }
  func.func @transform_4(%arg0: i32) -> (i32, i32) {
    %c0_i32 = arith.constant 0 : i32
    %c0_i32_0 = arith.constant 0 : i32
    %c0_i32_1 = arith.constant 0 : i32
    return %c0_i32, %c0_i32_0 : i32, i32
  }
  func.func @transform_5(%arg0: i32) -> (i32, i32) {
    %c0_i32 = arith.constant 0 : i32
    %c0_i32_0 = arith.constant 0 : i32
    %c0_i32_1 = arith.constant 0 : i32
    return %c0_i32, %c0_i32_0 : i32, i32
  }
  func.func @transform_6(%arg0: i32) -> (i32, i32) {
    %c0_i32 = arith.constant 0 : i32
    %c0_i32_0 = arith.constant 0 : i32
    %c0_i32_1 = arith.constant 0 : i32
    return %c0_i32, %c0_i32_0 : i32, i32
  }
  func.func @transform_7(%arg0: i32) -> (i32, i32) {
    %c0_i32 = arith.constant 0 : i32
    %c0_i32_0 = arith.constant 0 : i32
    return %arg0, %c0_i32 : i32, i32
  }
}

</mosaic_0001>

<bundles_post_ra>
// kernel: tpu_custom_call.1
= control target key start
LH: loop header
LB: loop body
LE: loop exit
PB: predicated region body
PF: predicated region fallthrough
CT: control target
= control target key end

     0   :  { %12 = vsyncpa [#allocation3], 0  ;;  %s1362_s0 = inlined_call_operand.vmem [shape: bf16[128,8], index: 0, kind: input, shape index: {}]   ;;  %s1363_s1 = inlined_call_operand.vmem [shape: bf16[8,128], index: 1, kind: input, shape index: {}]   ;;  %s1364_s2 = inlined_call_operand.vmem [shape: f32[1,128], index: 2, kind: input, shape index: {}]   ;;  %s1365_s3 = inlined_call_operand.vmem [shape: bf16[128,128], index: 3, kind: input, shape index: {}]   ;;  %s1366_s4 = inlined_call_operand.vmem [shape: f32[1,128], index: 4, kind: input, shape index: {}]   ;;  %s1367_s5 = inlined_call_operand.hbm [shape: bf16[128,128], index: 5, kind: input, shape index: {}]   ;;  %s1368_s6 = inlined_call_operand.vmem [shape: f32[1,128], index: 6, kind: input, shape index: {}]   ;;  %s1369_s7 = inlined_call_operand.hbm [shape: f32[128,128], index: 7, kind: output, shape index: {}]  }
   0x1   :  { %13 = vsyncpa [#allocation4], 0 }
   0x2   :  { %15 = vsyncpa [#allocation4 + $0x1], 0  ;;  %s1151_s24 = smov 0   ;;  %s1153_s25 = smov 0  }
   0x3   :  { %s1155_s26 = smov 0   ;;  %s1157_s27 = smov 0  }
   0x4 LB: > { %s1172_s28 = sadd.s32 4294967295, %s1103_s27   ;;  %s809_s29 = sadd.s32 4294967294, %s1103_s27   ;;  %s1103_s27 = sphi %s1157_s27, %s1377_s27   ;;  %s1099_s26 = sphi %s1155_s26, %s1376_s26   ;;  %s1095_s25 = sphi %s1153_s25, %s1375_s25   ;;  %s1091_s24 = sphi %s1151_s24, %s1374_s24  }
   0x5   : > { %s1176_s30 = sadd.s32 1, %s1103_s27   ;;  %s180_s8 = sadd.s32 1, %s1099_s26 }
   0x6   : > { %s177_s9 = ssub.s32 %s1103_s27, %s1176_s30  ;;  %p190_p0 = scmp.ne.s32.totalorder %s1099_s26, %s1095_s25 }
   0x7   : > { %p178_p1 = scmp.eq.s32.totalorder %s177_s9, 0  ;;  %p191_p2 = scmp.eq.s32.totalorder %s1172_s28, 3 }
   0x8   : > { %p196_p3 = scmp.ne.s32.totalorder %s1095_s25, %s1091_s24  ;;  %p197_p4 = scmp.eq.s32.totalorder %s809_s29, 3 }
   0x9   : > { %s1187_s10 = scalar_select %p178_p1, %s1099_s26, %s180_s8  }
   0xa   : > { %p1189_p5 = por %p191_p2, %p190_p0  ;;  %p1193_p6 = por %p197_p4, %p196_p3 }
   0xb   : > { %p810_p7 = scmp.ge.s32.totalorder %s1103_s27, 1  ;;  %p204_p8 = scmp.lt.s32.totalorder %s1103_s27, 5 }
   0xc   : > { %s1371_s12 = scalar_select %p1193_p6, 1, 0 }
   0xd   : > { %p931_p9 = scmp.eq.s32.totalorder %s1172_s28, 0  ;;  %p1200_p10 = pnand %p810_p7, %p204_p8 }
   0xe   : > { %s1105_s14 = smov [#allocation2]  }
   0xf   : > { %s228_s15 = sshll.u32 %s1105_s14, 4  ;;  %p923_p11 = pneg %p1200_p10  ;;  %s229_s15 = int_to_ptr.vmem [resolvable:$true] %s228_s15 }
  0x10   : > { %s1024_s16 = scalar_lea.vmem %s229_s15, 1024  ;;  %p1032_p3 = scmp.lt.s32.totalorder %s229_s15, %s229_s15 }
  0x11   : > { %p924_p12 = pnand %p931_p9, %p923_p11  ;;  %p1025_p0 = scmp.ne.s32.totalorder %s229_s15, %s1024_s16 }
  0x12   : > { %p1033_p4 = scmp.lt.s32.totalorder %s1024_s16, %s1024_s16 }
  0x13   : > { %p1015_p13 = pneg %p924_p12 }
  0x14   : > { %p1034_p6 = por %p1033_p4, %p1032_p3 }
  0x15   : > { %p1027_p1 = pnand %p1025_p0, %p1015_p13 }
  0x17   : > { %p1028_p2 = pneg %p1027_p1 }
  0x19   : > { %p1035_p7 = pnand %p1034_p6, %p1028_p2 }
  0x1b   : > { %1038 = shalt.err (!%p1035_p7)
}
  0x1c   : > { %s1106_s17 = smov 64   ;;  %s1107_s18 = smov 4  }
  0x1d   : > { %926 = dma.hbm_to_vmem [thread:$0]  (!%p924_p12), %s1367_s5, 1024, %s229_s15, [#allocation3], %s1106_s17, %s1106_s17, %s1107_s18  }
  0x1e   : > { %256 = sbr.rel (%p1200_p10) target bundleno = 714 (0x2ca), region = 48 }
  0x23   : > { %1082 = dma.done.wait (%p931_p9), [#allocation3], 1024  }
  0x24   : > { %1084 = vsyncadd (%p931_p9), [#allocation3], 4294966272  ;;  %s816_s21 = sshll.u32 %s1172_s28, 2  ;;  %vm325_vm0 = vcmask 1043456   ;;  %vm318_vm1 = vcmask 64512   ;;  %v973_v4 = vld [vmem:[%s1365_s3 + $0x38] sm:$0xff]  }
  0x25   : > { %p289_p8 = scmp.lt.s32.totalorder %s816_s21, 15  ;;  %v300_v0 = vld [vmem:[%s1363_s1] sm:$0xf]  ;;  %v974_v5 = vld [vmem:[%s1365_s3 + $0x30] sm:$0xff]   ;;  %876 = vmatprep.subr.bf16.mxu1 %v973_v4  ;;  %v975_v6 = vld [vmem:[%s1365_s3 + $0x28] sm:$0xff]   ;;  %s1108_s17 = smov [#allocation5]  }
  0x26   : > { %916 = vmatprep.subr.msk.bf16.mxu0 %vm325_vm0, %v300_v0  ;;  %v327_v1 = vsel %vm325_vm0, %v300_v0, 0  ;;  %877 = vmatpush3.bf16.msra.mxu1 %v973_v4  ;;  %v976_v7 = vld [vmem:[%s1365_s3 + $0x20] sm:$0xff]   ;;  %v977_v8 = vld [vmem:[%s1365_s3 + $0x18] sm:$0xff]   ;;  %v978_v9 = vld [vmem:[%s1365_s3 + $0x10] sm:$0xff]   ;;  %s1043_s18 = sshll.u32 %s1108_s17, 4  ;;  %s1044_s18 = int_to_ptr.vmem [resolvable:$false] %s1043_s18 }
  0x27   : > { %s1379_s21 = smov (!%p289_p8, %s816_s21), 15  ;;  %871 = vmatpush3.bf16.msra.mxu0 %v327_v1  ;;  %878 = vmatprep.subr.bf16.mxu1 %v974_v5  ;;  %v979_v10 = vld [vmem:[%s1365_s3 + $0x8] sm:$0xff]   ;;  %v980_v11 = vld [vmem:[%s1365_s3] sm:$0xff]   ;;  %v981_v12 = vld [vmem:[#allocation2 + $0x38] sm:$0xff]   ;;  %s1045_s19 = scalar_lea.vmem %s1044_s18, 1024 }
  0x28   : > { %s817_s22 = sshll.u32 %s1379_s21, 2  ;;  %v982_v13 = vld [vmem:[#allocation2 + $0x30] sm:$0xff]   ;;  %896 = vmatprep.subr.bf16.mxu0 %v981_v12  ;;  %v983_v14 = vld [vmem:[#allocation2 + $0x28] sm:$0xff]   ;;  %v984_v15 = vld [vmem:[#allocation2 + $0x20] sm:$0xff]  }
  0x29   : > { %s292_s8 = scalar_lea.vmem %s1362_s0, %s817_s22  ;;  %v985_v16 = vld [vmem:[#allocation2 + $0x18] sm:$0xff]   ;;  %v818_v19 = vld [vmem:[%s1364_s2] ss:$0 sm:$0xff]  ;;  %v986_v32 = vld [vmem:[#allocation2 + $0x10] sm:$0xff]   ;;  %s285_s22 = sand.u32 1, %s1095_s25  }
  0x2a   : > { %v971_v2 = vld [vmem:[%s292_s8] sm:$0xff]   ;;  %v972_v3 = vld [vmem:[%s292_s8 + $0x8] sm:$0xff]   ;;  %879 = vmatpush3.bf16.msra.mxu1 %v974_v5  ;;  %s1281_s23 = sshll.u32 %s285_s22, 5  ;;  %s846_s8 = sshll.u32 %s1172_s28, 9 }
  0x2b   : > { %872 = vmatprep.mubr.msk.bf16.mxu0 %vm318_vm1, %v971_v2  ;;  %880 = vmatprep.subr.bf16.mxu1 %v975_v6  ;;  %v987_v33 = vld [vmem:[#allocation2 + $0x8] sm:$0xff]   ;;  %v988_v34 = vld [vmem:[#allocation2] sm:$0xff]   ;;  %s287_s29 = scalar_lea.vmem [#allocation5], %s1281_s23  ;;  %s1313_s15 = scalar_lea.hbm %s1369_s7, %s846_s8 }
  0x2c   : > { %873 = vmatmul.mubr.msk.bf16.vlgmr.msra.gmra.mxu0 %vm318_vm1, %v972_v3  ;;  %v823_v37 = vld [vmem:[%s1366_s4] ss:$0 sm:$0xff]  ;;  %s735_s9 = sshll.u32 %s287_s29, 4  ;;  %s1322_s28 = scalar_lea.sflag [#allocation4], %s285_s22  ;;  %s1315_s9 = int_to_ptr.vmem [resolvable:$true] %s735_s9 }
  0x2d   : > { %897 = vmatpush3.bf16.msra.mxu0 %v981_v12  ;;  %v832_v50 = vld [vmem:[%s1368_s6] ss:$0 sm:$0xff]  ;;  %s1039_s16 = scalar_lea.vmem %s1315_s9, 512  ;;  %p1046_p11 = scmp.lt.s32.totalorder %s1315_s9, %s1044_s18 }
  0x2e   : > { %881 = vmatpush3.bf16.msra.mxu1 %v975_v6  ;;  %898 = vmatprep.subr.bf16.mxu0 %v982_v13  ;;  %p1040_p6 = scmp.ne.s32.totalorder %s1315_s9, %s1039_s16  ;;  %p1047_p12 = scmp.lt.s32.totalorder %s1045_s19, %s1039_s16 }
  0x2f   : > { %882 = vmatprep.subr.bf16.mxu1 %v976_v7 }
  0x30   : > { %p1041_p9 = pnand %p1040_p6, %p1189_p5  ;;  %p1048_p13 = por %p1047_p12, %p1046_p11 }
  0x31   : > { %899 = vmatpush3.bf16.msra.mxu0 %v982_v13 }
  0x32   : > { %883 = vmatpush3.bf16.msra.mxu1 %v976_v7  ;;  %900 = vmatprep.subr.bf16.mxu0 %v983_v14  ;;  %p1042_p10 = pneg %p1041_p9 }
  0x33   : > { %884 = vmatprep.subr.bf16.mxu1 %v977_v8 }
  0x34   : > { %p1049_p0 = pnand %p1048_p13, %p1042_p10 }
  0x35   : > { %901 = vmatpush3.bf16.msra.mxu0 %v983_v14 }
  0x36   : > { %885 = vmatpush3.bf16.msra.mxu1 %v977_v8  ;;  %902 = vmatprep.subr.bf16.mxu0 %v984_v15 }
  0x37   : > { %886 = vmatprep.subr.bf16.mxu1 %v978_v9 }
  0x39   : > { %903 = vmatpush3.bf16.msra.mxu0 %v984_v15 }
  0x3a   : > { %887 = vmatpush3.bf16.msra.mxu1 %v978_v9  ;;  %904 = vmatprep.subr.bf16.mxu0 %v985_v16 }
  0x3b   : > { %888 = vmatprep.subr.bf16.mxu1 %v979_v10 }
  0x3d   : > { %905 = vmatpush3.bf16.msra.mxu0 %v985_v16  ;;  %v630_v16 = vlaneseq }
  0x3e   : > { %889 = vmatpush3.bf16.msra.mxu1 %v979_v10  ;;  %906 = vmatprep.subr.bf16.mxu0 %v986_v32 }
  0x3f   : > { %890 = vmatprep.subr.bf16.mxu1 %v980_v11 }
  0x41   : > { %907 = vmatpush3.bf16.msra.mxu0 %v986_v32 }
  0x42   : > { %891 = vmatpush3.bf16.msra.mxu1 %v980_v11  ;;  %908 = vmatprep.subr.bf16.mxu0 %v987_v33 }
  0x45   : > { %909 = vmatpush3.bf16.msra.mxu0 %v987_v33 }
  0x46   : > { %910 = vmatprep.subr.bf16.mxu0 %v988_v34 }
  0x49   : > { %911 = vmatpush3.bf16.msra.mxu0 %v988_v34 }
  0xec   : > { %v874_v17 = vpop.f32.mrf.mxu0 }
  0xed   : > { %v372_v23 = vadd.f32 %v874_v17, %v818_v19 }
  0xee   : > { %v363_v18 = vpop.f32.mrf.mxu0 }
  0xef   : > { %v364_v21 = vadd.f32 %v818_v19, %v363_v18  ;;  %v380_v29 = vmax.f32 %v372_v23, 0.0 }
  0xf0   : > { %v875_v20 = vpop.f32.mrf.mxu0 }
  0xf1   : > { %v375_v22 = vadd.f32 %v875_v20, %v818_v19  ;;  %v378_v27 = vmax.f32 %v364_v21, 0.0  ;;  %v1277_v21 = vand.u32 127, %v630_v16 }
  0xf2   : > { %v366_v24 = vpop.f32.mrf.mxu0 }
  0xf3   : > { %v367_v25 = vadd.f32 %v818_v19, %v366_v24  ;;  %v381_v26 = vmax.f32 %v375_v22, 0.0  ;;  %vm712_vm4 = vcmp.lt.s32.totalorder %v1277_v21, 64 }
  0xf5   : > { %v379_v28 = vmax.f32 %v367_v25, 0.0  ;;  %v383_v31 = vpack.c.bf16 %v381_v26, %v380_v29 }
  0xf7   : > { %v382_v30 = vpack.c.bf16 %v379_v28, %v378_v27 }
  0xf9   : > { %892 = vmatprep.mubr.bf16.mxu1 %v382_v30 }
  0xfa   : > { %893 = vmatmul.mubr.bf16.vlgmr.msra.gmra.mxu1 %v383_v31 }
 0x1ba   : > { %v894_v35 = vpop.f32.mrf.mxu1 }
 0x1bb   : > { %v498_v41 = vadd.f32 %v894_v35, %v823_v37 }
 0x1bc   : > { %v489_v36 = vpop.f32.mrf.mxu1 }
 0x1bd   : > { %v490_v39 = vadd.f32 %v823_v37, %v489_v36  ;;  %v506_v47 = vmax.f32 %v498_v41, 0.0 }
 0x1be   : > { %v895_v38 = vpop.f32.mrf.mxu1 }
 0x1bf   : > { %v501_v40 = vadd.f32 %v895_v38, %v823_v37  ;;  %v504_v45 = vmax.f32 %v490_v39, 0.0 }
 0x1c0   : > { %v492_v42 = vpop.f32.mrf.mxu1 }
 0x1c1   : > { %v493_v43 = vadd.f32 %v823_v37, %v492_v42  ;;  %v507_v44 = vmax.f32 %v501_v40, 0.0 }
 0x1c3   : > { %v505_v46 = vmax.f32 %v493_v43, 0.0  ;;  %v509_v49 = vpack.c.bf16 %v507_v44, %v506_v47 }
 0x1c5   : > { %v508_v48 = vpack.c.bf16 %v505_v46, %v504_v45 }
 0x1c7   : > { %912 = vmatprep.mubr.bf16.mxu0 %v508_v48 }
 0x1c8   : > { %913 = vmatmul.mubr.bf16.vlgmr.msra.gmra.mxu0 %v509_v49 }
 0x288   : > { %v914_v51 = vpop.f32.mrf.mxu0 }
 0x289   : > { %v1257_v52 = vadd.f32 %v914_v51, %v832_v50 }
 0x28a   : > { %v615_v53 = vpop.f32.mrf.mxu0 }
 0x28b   : > { %v654_v54 = vand.u32 2147483647, %v1257_v52  ;;  %v1260_v55 = vadd.f32 %v832_v50, %v615_v53  ;;  %v642_v29 = vmax.f32 %v1257_v52, 0.0  ;;  %vm646_vm3 = vcmp.ne.f32.partialorder %v1257_v52, %v1257_v52 }
 0x28c   : > { %v915_v56 = vpop.f32.mrf.mxu0 }
 0x28d   : > { %v658_v57 = vsub.f32 0.0, %v654_v54  ;;  %v1262_v58 = vadd.f32 %v915_v56, %v832_v50  ;;  %v652_v59 = vand.u32 2147483647, %v1260_v55  ;;  %v640_v36 = vmax.f32 %v1260_v55, 0.0 }
 0x28e   : > { %v618_v60 = vpop.f32.mrf.mxu0  ;;  %vm644_vm7 = vcmp.ne.f32.partialorder %v1260_v55, %v1260_v55 }
 0x28f   : > { %v664_v61 = vmul.f32 1.442695, %v658_v57  ;;  %v656_v62 = vsub.f32 0.0, %v652_v59  ;;  %v655_v63 = vand.u32 2147483647, %v1262_v58  ;;  %v1266_v0 = vadd.f32 %v832_v50, %v618_v60 }
 0x290   : > { %v643_v50 = vmax.f32 %v1262_v58, 0.0  ;;  %vm647_vm8 = vcmp.ne.f32.partialorder %v1262_v58, %v1262_v58 }
 0x291   : > { %989 = vpow2.f32 %v664_v61  ;;  %v660_v1 = vmul.f32 1.442695, %v656_v62  ;;  %v659_v2 = vsub.f32 0.0, %v655_v63  ;;  %v653_v3 = vand.u32 2147483647, %v1266_v0 }
 0x292   : > { %v641_v63 = vmax.f32 %v1266_v0, 0.0  ;;  %vm645_vm10 = vcmp.ne.f32.partialorder %v1266_v0, %v1266_v0 }
 0x293   : > { %991 = vpow2.f32 %v660_v1  ;;  %v666_v4 = vmul.f32 1.442695, %v659_v2  ;;  %v657_v5 = vsub.f32 0.0, %v653_v3 }
 0x295   : > { %993 = vpow2.f32 %v666_v4  ;;  %v662_v6 = vmul.f32 1.442695, %v657_v5 }
 0x297   : > { %995 = vpow2.f32 %v662_v6 }
 0x29e   : > { %v990_v7 = vpop.eup %989 }
 0x29f   : > { %v686_v8 = vadd.f32 1.0, %v990_v7  ;;  %v689_v14 = vmul.f32 -0.5, %v990_v7  ;;  %v692_v19 = vand.u32 2147483647, %v990_v7 }
 0x2a0   : > { %v992_v9 = vpop.eup %991 }
 0x2a1   : > { %997 = vlog2.f32 %v686_v8  ;;  %v668_v10 = vadd.f32 1.0, %v992_v9  ;;  %v671_v17 = vmul.f32 -0.5, %v992_v9  ;;  %v690_v18 = vadd.f32 1.0, %v689_v14 }
 0x2a2   : > { %v994_v11 = vpop.eup %993  ;;  %999 = vtanh.f32 %v1257_v52  ;;  %v674_v26 = vand.u32 2147483647, %v992_v9  ;;  %vm693_vm2 = vcmp.lt.f32.partialorder %v692_v19, 0.0004427343 }
 0x2a3   : > { %1001 = vlog2.f32 %v668_v10  ;;  %v695_v12 = vadd.f32 1.0, %v994_v11  ;;  %v698_v20 = vmul.f32 -0.5, %v994_v11  ;;  %v672_v23 = vadd.f32 1.0, %v671_v17 }
 0x2a4   : > { %1003 = vtanh.f32 %v1260_v55  ;;  %v1271_v13 = vpop.eup %995  ;;  %v691_v25 = vmul.f32 %v990_v7, %v690_v18  ;;  %v701_v33 = vand.u32 2147483647, %v994_v11  ;;  %vm675_vm5 = vcmp.lt.f32.partialorder %v674_v26, 0.0004427343 }
 0x2a5   : > { %1005 = vlog2.f32 %v695_v12  ;;  %v677_v15 = vadd.f32 1.0, %v1271_v13  ;;  %v680_v27 = vmul.f32 -0.5, %v1271_v13  ;;  %v699_v30 = vadd.f32 1.0, %v698_v20 }
 0x2a6   : > { %1007 = vtanh.f32 %v1262_v58  ;;  %v673_v38 = vmul.f32 %v992_v9, %v672_v23  ;;  %v683_v42 = vand.u32 2147483647, %v1271_v13  ;;  %vm702_vm6 = vcmp.lt.f32.partialorder %v701_v33, 0.0004427343 }
 0x2a7   : > { %1009 = vlog2.f32 %v677_v15  ;;  %v681_v41 = vadd.f32 1.0, %v680_v27  ;;  %v700_v46 = vmul.f32 %v994_v11, %v699_v30 }
 0x2a8   : > { %1011 = vtanh.f32 %v1266_v0  ;;  %vm684_vm9 = vcmp.lt.f32.partialorder %v683_v42, 0.0004427343 }
 0x2a9   : > { %v682_v59 = vmul.f32 %v1271_v13, %v681_v41 }
 0x2ae   : > { %v998_v22 = vpop.eup %997 }
 0x2af   : > { %v688_v24 = vmul.f32 0.6931472, %v998_v22  ;;  %v1000_v28 = vpop.eup %999 }
 0x2b0   : > { %v1002_v31 = vpop.eup %1001  ;;  %v638_v40 = vmul.f32 2.0, %v1000_v28 }
 0x2b1   : > { %v694_v32 = vsel %vm693_vm2, %v691_v25, %v688_v24  ;;  %v1004_v34 = vpop.eup %1003  ;;  %v670_v37 = vmul.f32 0.6931472, %v1002_v31 }
 0x2b2   : > { %v706_v35 = vadd.f32 %v694_v32, %v642_v29  ;;  %v1006_v39 = vpop.eup %1005  ;;  %v636_v53 = vmul.f32 2.0, %v1004_v34 }
 0x2b3   : > { %v676_v44 = vsel %vm675_vm5, %v673_v38, %v670_v37  ;;  %v697_v45 = vmul.f32 0.6931472, %v1006_v39  ;;  %v1008_v47 = vpop.eup %1007 }
 0x2b4   : > { %v710_v43 = vsel %vm646_vm3, %v1257_v52, %v706_v35  ;;  %v704_v49 = vadd.f32 %v676_v44, %v640_v36  ;;  %v1010_v51 = vpop.eup %1009  ;;  %v639_v62 = vmul.f32 2.0, %v1008_v47 }
 0x2b5   : > { %v715_v48 = vsel %vm712_vm4, %v638_v40, %v710_v43  ;;  %v703_v52 = vsel %vm702_vm6, %v700_v46, %v697_v45  ;;  %v679_v57 = vmul.f32 0.6931472, %v1010_v51  ;;  %v1012_v60 = vpop.eup %1011 }
 0x2b6   : > { %719 = vst [vmem:[%s287_s29 + $0x10] sm:$0xff] %v715_v48  ;;  %v708_v54 = vsel %vm644_vm7, %v1260_v55, %v704_v49  ;;  %v707_v56 = vadd.f32 %v703_v52, %v643_v50  ;;  %v637_v4 = vmul.f32 2.0, %v1012_v60 }
 0x2b7   : > { %v713_v61 = vsel %vm712_vm4, %v636_v53, %v708_v54  ;;  %v685_v55 = vsel %vm684_vm9, %v682_v59, %v679_v57 }
 0x2b8   : > { %717 = vst [vmem:[%s287_s29] sm:$0xff] %v713_v61  ;;  %v711_v1 = vsel %vm647_vm8, %v1262_v58, %v707_v56  ;;  %v705_v3 = vadd.f32 %v685_v55, %v641_v63 }
 0x2b9   : > { %v716_v2 = vsel %vm712_vm4, %v639_v62, %v711_v1 }
 0x2ba   : > { %720 = vst [vmem:[%s287_s29 + $0x18] sm:$0xff] %v716_v2  ;;  %v709_v58 = vsel %vm645_vm10, %v1266_v0, %v705_v3 }
 0x2bb   : > { %v714_v5 = vsel %vm712_vm4, %v637_v4, %v709_v58 }
 0x2bc   : > { %718 = vst [vmem:[%s287_s29 + $0x8] sm:$0xff] %v714_v5 }
 0x2bd   : > { %1052 = shalt.err (!%p1049_p0)
}
 0x2be   : > { %s1053_s20 = scalar_lea.hbm %s1313_s15, 512  ;;  %s1057_s23 = scalar_lea.hbm %s1369_s7, 2048 }
 0x2bf   : > { %p1054_p1 = scmp.ne.s32.totalorder %s1313_s15, %s1053_s20  ;;  %p1058_p4 = scmp.lt.s32.totalorder %s1313_s15, %s1369_s7 }
 0x2c0   : > { %p1059_p7 = scmp.lt.s32.totalorder %s1057_s23, %s1053_s20 }
 0x2c1   : > { %p1055_p2 = pnand %p1054_p1, %p1189_p5 }
 0x2c2   : > { %p1060_p8 = por %p1059_p7, %p1058_p4 }
 0x2c3   : > { %p1056_p3 = pneg %p1055_p2 }
 0x2c5   : > { %p1061_p6 = pnand %p1060_p8, %p1056_p3 }
 0x2c7   : > { %1064 = shalt.err (!%p1061_p6)
}
 0x2c8   : > { %s1109_s13 = smov 128   ;;  %s1110_s14 = smov 8  }
 0x2c9   : > { %921 = dma.vmem_to_hbm [thread:$0]  (%p1189_p5), %s1315_s9, 512, %s1313_s15, %s1322_s28, %s1109_s13, %s1109_s13, %s1110_s14  }
 0x2ca PF: > { %p933_p9 = scmp.ge.s32.totalorder %s1103_s27, 2  ;;  %s750_s16 = sand.u32 1, %s1091_s24  }
 0x2cb   : > { %p1373_p10 = scmp.ne.s32.totalorder %s1371_s12, 0  ;;  %s751_s17 = scalar_lea.sflag [#allocation4], %s750_s16 }
 0x2cd   : > { %p928_p11 = pnand %p933_p9, %p1373_p10 }
 0x2cf   : > { %p929_p12 = pneg %p928_p11 }
 0x2d1   : > { %1086 = dma.done.wait (%p929_p12), %s751_s17, 512  }
 0x2d2   : > { %1088 = vsyncadd (%p929_p12), %s751_s17, 4294966784  ;;  %p18_p13 = scmp.ge.s32.totalorder %s1176_s30, 6   ;;  %s1374_s24 = smov %s1095_s25 }
 0x2d3   : > { %s1375_s25 = smov %s1099_s26  ;;  %s1376_s26 = smov %s1187_s10 }
 0x2d4   : > { %s1377_s27 = smov %s1176_s30  ;;  %20 = sbr.rel (!%p18_p13) target bundleno = 4 (0x4), region = 88 }
 0x2d9   :  { %756 = vsyncpa [#allocation3], 1 }
 0x2da   :  { %758 = vsyncpa [#allocation3 + $0x1], 1 }
 0x2db   :  { %759 = vsyncpa [#allocation4], 1 }
 0x2dc   :  { %761 = vsyncpa [#allocation4 + $0x1], 1 }

</bundles_post_ra>
